<compile_context>
chip_gen: v7x
topology: tpu7x:2x2x1
jax: 0.10.0
libtpu: 0.0.40
codegen_flags: <defaults>
</compile_context>

<pallas_src>
import math
from typing import NamedTuple, Optional

import jax
import jax.numpy as jnp
from jax.experimental import pallas as pl
from jax.experimental.pallas import tpu as pltpu


def _round_up(x: int, m: int) -> int:
    return ((x + m - 1) // m) * m


def _pick_tiles(batch: int, out_features: int, in_features: int,
                tn: Optional[int] = None, tk: Optional[int] = None):
    """(8,128)-aligned, lane-dense tiles.

    tm covers the whole (padded) batch up to 512 rows.  tn/tk cover the whole
    padded dim when it fits under the cap (no fringe, no extra padding for
    mid-size layers); the caps (1024 / 512) are multiples of 256 so large
    layers feed the 2x256x256 MXU full-width.  If both parallel grid axes
    would collapse to a single block, split N so the v7x megacore (2 TCs)
    has >= 2 parallel blocks to shard.
    """
    tm = min(512, _round_up(max(batch, 1), 8))

    np0 = _round_up(out_features, 128)
    kp0 = _round_up(in_features, 128)
    user_tn = tn is not None
    if tn is None:
        tn = np0 if np0 <= 1024 else 1024
    if tk is None:
        tk = kp0 if kp0 <= 512 else 512
    tn = _round_up(tn, 128)
    tk = _round_up(tk, 128)

    m_tiles = -(-max(batch, 1) // tm)
    n_tiles = -(-_round_up(out_features, tn) // tn)
    if (not user_tn) and m_tiles == 1 and n_tiles == 1 and np0 >= 256:
        # Guarantee >= 2 parallel blocks (splitting N keeps the weight
        # streamed exactly once; only the tiny x is re-read).
        tn = _round_up(-(-np0 // 2), 128)
    return tm, tn, tk


class PreparedLinear(NamedTuple):
    w_kn: jax.Array        # (Kp, Np) weight, K-major (MXU-native), compute dtype
    b_row: jax.Array       # (1, Np) float32 bias row (zeros if layer has no bias)
    in_features: int
    out_features: int
    tn: int
    tk: int


def prepare_linear_params(weight, bias=None, *, batch_hint: int = 128,
                          compute_dtype=jnp.bfloat16,
                          tn: Optional[int] = None,
                          tk: Optional[int] = None) -> PreparedLinear:
    """One-time parameter layout prep: cast to the MXU compute dtype, transpose
    to the K-major (in, out) layout, and zero-pad to tile multiples.  Doing it
    once at init removes a full HBM read+write of the weight per forward call."""
    out_f, in_f = weight.shape
    _, tn, tk = _pick_tiles(batch_hint, out_f, in_f, tn=tn, tk=tk)
    kp = _round_up(in_f, tk)
    np_ = _round_up(out_f, tn)

    w_kn = jnp.transpose(weight).astype(compute_dtype)          # (in_f, out_f)
    if w_kn.shape != (kp, np_):
        w_kn = jnp.pad(w_kn, ((0, kp - in_f), (0, np_ - out_f)))

    b = bias if bias is not None else jnp.zeros((out_f,), jnp.float32)
    b_row = jnp.asarray(b, jnp.float32).reshape(1, out_f)
    if np_ != out_f:
        b_row = jnp.pad(b_row, ((0, 0), (0, np_ - out_f)))
    return PreparedLinear(w_kn, b_row, in_f, out_f, tn, tk)


def _linear_kernel(x_ref, w_ref, b_ref, o_ref, acc_ref):
    # grid = (M tiles, N tiles, K tiles); K (the reduction) is innermost.
    k = pl.program_id(2)

    @pl.when(k == 0)
    def _():
        # Seed the accumulator with the broadcast bias: removes a (tm, tn)
        # VPU pass from the epilogue and lets the bias DMA overlap step 0.
        acc_ref[...] = jnp.broadcast_to(b_ref[...].astype(jnp.float32),
                                        acc_ref.shape)

    # x:(tm,tk) @ w:(tk,tn) — weight is K-major so this is the MXU-native feed
    # (no per-step XLU transpose); accumulation stays in f32.
    acc_ref[...] += jnp.dot(x_ref[...], w_ref[...],
                            preferred_element_type=jnp.float32)

    @pl.when(k == pl.num_programs(2) - 1)
    def _():
        o_ref[...] = acc_ref[...].astype(o_ref.dtype)


def pallas_linear(x, weight=None, bias=None, *, prepared: Optional[PreparedLinear] = None,
                  compute_dtype=jnp.bfloat16,
                  tm: Optional[int] = None, tn: Optional[int] = None,
                  tk: Optional[int] = None):
    """Forward pass of the PyTorch `Linear` module: x @ weight.T (+ bias).

    `x` is (batch, in_features); `weight` is (out_features, in_features)
    (PyTorch layout).  Pass `prepared=prepare_linear_params(...)` to skip the
    per-call cast/transpose/pad of the parameters (tn/tk overrides are then
    taken from the prepared params).
    """
    B, in_f = x.shape
    out_dtype = x.dtype

    if prepared is None:
        if weight is None:
            raise ValueError("either `weight` or `prepared` must be given")
        out_f_w, in_f_w = weight.shape
        if in_f_w != in_f:
            raise ValueError("weight must be (out_features, in_features)")
        prepared = prepare_linear_params(weight, bias, batch_hint=B,
                                         compute_dtype=compute_dtype,
                                         tn=tn, tk=tk)
    out_f = prepared.out_features
    if prepared.in_features != in_f:
        raise ValueError("prepared params do not match x's in_features")

    w_kn, b_row = prepared.w_kn, prepared.b_row
    cdtype = w_kn.dtype
    kp, np_ = w_kn.shape
    tn_, tk_ = prepared.tn, prepared.tk
    tm_ = _round_up(tm, 8) if tm is not None else min(512, _round_up(B, 8))
    bp = _round_up(B, tm_)

    # Activations: cast to the MXU compute dtype (bf16 by default: peak MXU
    # throughput + halved bandwidth), then zero-pad to tile multiples (zero K
    # padding is a no-op for the dot).
    xp = x.astype(cdtype)
    if xp.shape != (bp, kp):
        xp = jnp.pad(xp, ((0, bp - B), (0, kp - in_f)))

    m_tiles, n_tiles, k_tiles = bp // tm_, np_ // tn_, kp // tk_
    grid = (m_tiles, n_tiles, k_tiles)

    # Small-batch / GEMV regime: HBM-bound on weight streaming with very short
    # compute per step — deepen the weight pipeline to hide DMA latency.
    w_spec_kwargs = {}
    if m_tiles == 1 and k_tiles >= 3:
        w_spec_kwargs["pipeline_mode"] = pl.Buffered(3)
    n_w_bufs = 3 if w_spec_kwargs else 2

    cbytes = jnp.dtype(cdtype).itemsize
    obytes = jnp.dtype(out_dtype).itemsize
    footprint = (2 * tm_ * tk_ * cbytes            # x double-buffer
                 + n_w_bufs * tk_ * tn_ * cbytes   # weight buffers
                 + 2 * tn_ * 4                     # bias buffers
                 + 2 * tm_ * tn_ * obytes          # output double-buffer
                 + tm_ * tn_ * 4)                  # f32 accumulator
    # Raise the scoped VMEM limit (v5e default is only 16 MiB) but cap at
    # 48 MiB so the same config never overruns v7x's 64 MiB physical VMEM.
    vmem_limit = int(max(32 << 20, min(2 * footprint, 48 << 20)))

    cost = pl.CostEstimate(
        flops=2 * B * in_f * out_f,
        transcendentals=0,
        # x is re-streamed once per N tile, the weight once per M tile.
        bytes_accessed=(n_tiles * xp.size * cbytes
                        + m_tiles * w_kn.size * cbytes
                        + m_tiles * b_row.size * 4
                        + bp * np_ * obytes),
    )

    out_padded = pl.pallas_call(
        _linear_kernel,
        out_shape=jax.ShapeDtypeStruct((bp, np_), out_dtype),
        grid_spec=pltpu.PrefetchScalarGridSpec(
            num_scalar_prefetch=0,
            grid=grid,
            in_specs=[
                pl.BlockSpec((tm_, tk_), lambda i, j, k: (i, k)),                   # x tile
                pl.BlockSpec((tk_, tn_), lambda i, j, k: (k, j), **w_spec_kwargs),  # weight tile (K-major)
                pl.BlockSpec((1, tn_), lambda i, j, k: (0, j)),                     # bias row
            ],
            out_specs=pl.BlockSpec((tm_, tn_), lambda i, j, k: (i, j)),
            scratch_shapes=[pltpu.VMEM((tm_, tn_), jnp.float32)],   # f32 accumulator
        ),
        compiler_params=pltpu.CompilerParams(
            dimension_semantics=("parallel", "parallel", "arbitrary"),
            vmem_limit_bytes=vmem_limit),
        cost_estimate=cost,
    )(xp, w_kn, b_row)

    if bp == B and np_ == out_f:
        return out_padded
    return out_padded[:B, :out_f]


def init_linear_params(key, in_features, out_features, bias=True):
    """Mirror of the PyTorch module's reset_parameters: kaiming_uniform_
    (a=sqrt(5)) on weight => bound 1/sqrt(fan_in); uniform(+-1/sqrt(fan_in)) bias."""
    kw, kb = jax.random.split(key)
    bound = 1.0 / math.sqrt(in_features)
    weight = jax.random.uniform(
        kw, (out_features, in_features), jnp.float32, -bound, bound)
    if bias:
        b = jax.random.uniform(kb, (out_features,), jnp.float32, -bound, bound)
    else:
        b = None
    return weight, b


# TODO(synk): the custom backward (grad_input = var_match_(grad_out @ W)) is a
# training-only autograd rule; only the forward pass is implemented here.

if __name__ == "__main__":
    key = jax.random.PRNGKey(0)
    k_x, k_p, k_x2, k_p2 = jax.random.split(key, 4)

    # --- canonical small shapes implied by the module: batch=8, in=32, out=64 ---
    batch, in_features, out_features = 8, 32, 64
    x = jax.random.normal(k_x, (batch, in_features), jnp.float32)
    weight, bias = init_linear_params(k_p, in_features, out_features, bias=True)
    ref = x @ weight.T + bias

    # (a) exact-precision path (f32 MXU feed) — tight correctness check.
    y32 = pallas_linear(x, weight, bias, compute_dtype=jnp.float32)
    jax.block_until_ready(y32)
    assert y32.shape == (batch, out_features)
    assert jnp.allclose(y32, ref, atol=1e-5, rtol=1e-5)

    # no-bias variant (same kernel; zeros bias row).
    y32_nb = pallas_linear(x, weight, None, compute_dtype=jnp.float32)
    jax.block_until_ready(y32_nb)
    assert jnp.allclose(y32_nb, x @ weight.T, atol=1e-5, rtol=1e-5)

    # (b) default bf16 MXU feed with one-time prepared params (no per-call
    #     weight pad/transpose/cast).  Compare vs. bf16-rounded-input reference.
    prep = prepare_linear_params(weight, bias, batch_hint=batch)
    y = pallas_linear(x, prepared=prep)
    jax.block_until_ready(y)
    xb = x.astype(jnp.bfloat16).astype(jnp.float32)
    wb = weight.astype(jnp.bfloat16).astype(jnp.float32)
    ref_b = xb @ wb.T + bias
    assert jnp.allclose(y, ref_b, atol=1e-3, rtol=1e-3)
    assert jnp.allclose(y, ref, atol=1e-1, rtol=1e-1)   # sanity vs f32 reference

    # (c) multi-tile grid with fringe padding, megacore N-split, and the
    #     GEMV-regime Buffered(3) weight pipeline (m_tiles==1, k_tiles>=3).
    B2, IN2, OUT2 = 16, 1664, 384
    x2 = jax.random.normal(k_x2, (B2, IN2), jnp.float32)
    w2, b2 = init_linear_params(k_p2, IN2, OUT2, bias=True)
    y2 = pallas_linear(x2, w2, b2)
    jax.block_until_ready(y2)
    ref2 = (x2.astype(jnp.bfloat16).astype(jnp.float32)
            @ w2.astype(jnp.bfloat16).astype(jnp.float32).T + b2)
    assert y2.shape == (B2, OUT2)
    assert jnp.allclose(y2, ref2, atol=5e-3, rtol=5e-3)

    print("KERNEL_OK")
</pallas_src>

<mosaic_0001>
module attributes {stable_mosaic.version = 11 : i64} {
  func.func @_linear_kernel(%arg0: i32, %arg1: i32, %arg2: i32, %arg3: memref<8x128xf32, #tpu.memory_space<vmem>>, %arg4: memref<128x128xf32, #tpu.memory_space<vmem>>, %arg5: memref<1x128xf32, #tpu.memory_space<vmem>>, %arg6: memref<8x128xf32, #tpu.memory_space<vmem>>, %arg7: memref<8x128xf32, #tpu.memory_space<vmem>>) attributes {dimension_semantics = [#tpu.dimension_semantics<parallel>, #tpu.dimension_semantics<parallel>, #tpu.dimension_semantics<arbitrary>], iteration_bounds = array<i64: 1, 1, 1>, scalar_prefetch = 0 : i64, scratch_operands = 1 : i64, tpu.core_type = #tpu.core_type<tc>, window_params = [{transform_indices = @transform_0, window_bounds = array<i64: 8, 128>}, {transform_indices = @transform_1, window_bounds = array<i64: 128, 128>}, {transform_indices = @transform_2, window_bounds = array<i64: 1, 128>}, {transform_indices = @transform_3, window_bounds = array<i64: 8, 128>}]} {
    %c0_i32 = arith.constant 0 : i32
    %0 = arith.cmpi eq, %arg2, %c0_i32 : i32
    %1 = arith.extui %0 : i1 to i32
    %c0_i32_0 = arith.constant 0 : i32
    %2 = arith.cmpi ne, %1, %c0_i32_0 : i32
    scf.if %2 {
      %c0_10 = arith.constant 0 : index
      %c0_11 = arith.constant 0 : index
      %12 = vector.load %arg5[%c0_10, %c0_11] : memref<1x128xf32, #tpu.memory_space<vmem>>, vector<1x128xf32>
      %13 = vector.shape_cast %12 : vector<1x128xf32> to vector<1x128xf32>
      %14 = vector.broadcast %13 : vector<1x128xf32> to vector<8x128xf32>
      %c0_12 = arith.constant 0 : index
      %c0_13 = arith.constant 0 : index
      %15 = vector.load %arg7[%c0_12, %c0_13] : memref<8x128xf32, #tpu.memory_space<vmem>>, vector<8x128xf32>
      tpu.vector_store %arg7[%c0_12, %c0_13], %14 {strides = array<i32>} : memref<8x128xf32, #tpu.memory_space<vmem>>, vector<8x128xf32>,
    } else {
    }
    %c0 = arith.constant 0 : index
    %c0_1 = arith.constant 0 : index
    %3 = vector.load %arg7[%c0, %c0_1] : memref<8x128xf32, #tpu.memory_space<vmem>>, vector<8x128xf32>
    %c0_2 = arith.constant 0 : index
    %c0_3 = arith.constant 0 : index
    %4 = vector.load %arg3[%c0_2, %c0_3] : memref<8x128xf32, #tpu.memory_space<vmem>>, vector<8x128xf32>
    %c0_4 = arith.constant 0 : index
    %c0_5 = arith.constant 0 : index
    %5 = vector.load %arg4[%c0_4, %c0_5] : memref<128x128xf32, #tpu.memory_space<vmem>>, vector<128x128xf32>
    %cst = arith.constant dense<0.000000e+00> : vector<8x128xf32>
    %6 = tpu.matmul %4, %5, %cst {dimension_numbers = #tpu.dot_dimension_numbers<[1], [0], [0], [1], [0, 0, 1, 1], [], []>} : vector<8x128xf32>, vector<128x128xf32>, vector<8x128xf32> -> vector<8x128xf32>
    %7 = arith.addf %3, %6 : vector<8x128xf32>
    %c0_6 = arith.constant 0 : index
    %c0_7 = arith.constant 0 : index
    %8 = vector.load %arg7[%c0_6, %c0_7] : memref<8x128xf32, #tpu.memory_space<vmem>>, vector<8x128xf32>
    tpu.vector_store %arg7[%c0_6, %c0_7], %7 {strides = array<i32>} : memref<8x128xf32, #tpu.memory_space<vmem>>, vector<8x128xf32>,
    %c0_i32_8 = arith.constant 0 : i32
    %9 = arith.cmpi eq, %arg2, %c0_i32_8 : i32
    %10 = arith.extui %9 : i1 to i32
    %c0_i32_9 = arith.constant 0 : i32
    %11 = arith.cmpi ne, %10, %c0_i32_9 : i32
    scf.if %11 {
      %c0_10 = arith.constant 0 : index
      %c0_11 = arith.constant 0 : index
      %12 = vector.load %arg7[%c0_10, %c0_11] : memref<8x128xf32, #tpu.memory_space<vmem>>, vector<8x128xf32>
      %c0_12 = arith.constant 0 : index
      %c0_13 = arith.constant 0 : index
      %13 = vector.load %arg6[%c0_12, %c0_13] : memref<8x128xf32, #tpu.memory_space<vmem>>, vector<8x128xf32>
      tpu.vector_store %arg6[%c0_12, %c0_13], %12 {strides = array<i32>} : memref<8x128xf32, #tpu.memory_space<vmem>>, vector<8x128xf32>,
    } else {
    }
    return
  }
  func.func @transform_0(%arg0: i32, %arg1: i32, %arg2: i32) -> (i32, i32) {
    %c0_i32 = arith.constant 0 : i32
    return %arg0, %arg2 : i32, i32
  }
  func.func @transform_1(%arg0: i32, %arg1: i32, %arg2: i32) -> (i32, i32) {
    %c0_i32 = arith.constant 0 : i32
    return %arg2, %arg1 : i32, i32
  }
  func.func @transform_2(%arg0: i32, %arg1: i32, %arg2: i32) -> (i32, i32) {
    %c0_i32 = arith.constant 0 : i32
    %c0_i32_0 = arith.constant 0 : i32
    return %c0_i32, %arg1 : i32, i32
  }
  func.func @transform_3(%arg0: i32, %arg1: i32, %arg2: i32) -> (i32, i32) {
    %c0_i32 = arith.constant 0 : i32
    return %arg0, %arg1 : i32, i32
  }
}

</mosaic_0001>

<bundles_post_ra>
// kernel: tpu_custom_call.1
= control target key start
LH: loop header
LB: loop body
LE: loop exit
PB: predicated region body
PF: predicated region fallthrough
CT: control target
= control target key end

     0   :  { %8 = vsyncpa [#allocation4], 0  ;;  %s395_s0 = inlined_call_operand.hbm [shape: f32[8,128], index: 0, kind: input, shape index: {}]   ;;  %s396_s1 = inlined_call_operand.hbm [shape: f32[128,128], index: 1, kind: input, shape index: {}]   ;;  %s397_s2 = inlined_call_operand.vmem [shape: f32[1,128], index: 2, kind: input, shape index: {}]   ;;  %s398_s3 = inlined_call_operand.hbm [shape: f32[8,128], index: 3, kind: output, shape index: {}]  }
   0x1   :  { %9 = vsyncpa [#allocation7], 0 }
   0x2   :  { %10 = vsyncpa [#allocation5], 0  ;;  %s321_s12 = smov [#allocation3]   ;;  %s322_s14 = smov [#allocation6]  }
   0x3   :  { %s17_s13 = sshll.u32 %s321_s12, 4  ;;  %s26_s15 = sshll.u32 %s322_s14, 4  ;;  %s18_s13 = int_to_ptr.vmem [resolvable:$true] %s17_s13  ;;  %s349_s15 = int_to_ptr.vmem [resolvable:$true] %s26_s15 }
   0x4   :  { %s249_s18 = scalar_lea.hbm %s395_s0, 128 }
   0x5   :  { %p250_p0 = scmp.ne.s32.totalorder %s395_s0, %s249_s18  ;;  %p253_p1 = scmp.lt.u32.totalorder %s249_s18, %s395_s0 }
   0x7   :  { %p255_p2 = pnand %p253_p1, %p250_p0 }
   0x9   :  { %258 = shalt.err (!%p255_p2)
}
   0xa   :  { %s259_s23 = scalar_lea.vmem %s18_s13, 128  ;;  %p264_p4 = scmp.lt.s32.totalorder %s18_s13, %s18_s13 }
   0xb   :  { %p260_p3 = scmp.ne.s32.totalorder %s18_s13, %s259_s23  ;;  %p265_p5 = scmp.lt.s32.totalorder %s259_s23, %s259_s23 }
   0xd   :  { %p266_p6 = por %p265_p5, %p264_p4 }
   0xf   :  { %p267_p7 = pnand %p266_p6, %p260_p3 }
  0x11   :  { %270 = shalt.err (!%p267_p7)
}
  0x12   :  { %20 = dma.hbm_to_vmem [thread:$0]  %s395_s0, 128, %s18_s13, [#allocation4]  }
  0x13   :  { %s271_s28 = scalar_lea.hbm %s396_s1, 2048 }
  0x14   :  { %p272_p8 = scmp.ne.s32.totalorder %s396_s1, %s271_s28  ;;  %p275_p9 = scmp.lt.u32.totalorder %s271_s28, %s396_s1 }
  0x16   :  { %p277_p10 = pnand %p275_p9, %p272_p8 }
  0x18   :  { %280 = shalt.err (!%p277_p10)
}
  0x19   :  { %s281_s6 = scalar_lea.vmem %s349_s15, 2048  ;;  %p286_p12 = scmp.lt.s32.totalorder %s349_s15, %s349_s15 }
  0x1a   :  { %p282_p11 = scmp.ne.s32.totalorder %s349_s15, %s281_s6  ;;  %p287_p13 = scmp.lt.s32.totalorder %s281_s6, %s281_s6 }
  0x1c   :  { %p288_p0 = por %p287_p13, %p286_p12 }
  0x1e   :  { %p289_p1 = pnand %p288_p0, %p282_p11 }
  0x20   :  { %292 = shalt.err (!%p289_p1)
}
  0x21   :  { %s323_s0 = smov 128   ;;  %s324_s7 = smov 8  }
  0x22   :  { %32 = dma.hbm_to_vmem [thread:$0]  %s396_s1, 2048, %s349_s15, [#allocation7], %s323_s0, %s323_s0, %s324_s7  }
  0x23   :  { %315 = dma.done.wait [#allocation4], 128  }
  0x24   :  { %316 = vsyncadd [#allocation4], 4294967168 }
  0x25   :  { %317 = dma.done.wait [#allocation7], 2048  }
  0x26   :  { %318 = vsyncadd [#allocation7], 4294965248  ;;  %v325_v0 = vmov 0.0|0.0   ;;  %vm326_vm0 = vmmov 0   ;;  %v327_v1 = vmov 0.0   ;;  %v55_v2 = vld [vmem:[#allocation6] sm:$0xff] }
  0x27   :  { %217 = vmatprep.subr.bf16.mxu0 %v325_v0  ;;  %214 = vmatprep.mubr.msk.f32.mxu0 %vm326_vm0, %v327_v1  ;;  %v56_v3 = vld [vmem:[#allocation6 + $0x8] sm:$0xff]  ;;  %v57_v4 = vld [vmem:[#allocation6 + $0x10] sm:$0xff]  ;;  %v58_v6 = vld [vmem:[#allocation6 + $0x18] sm:$0xff]  ;;  %s328_s11 = smov [#allocation8]  }
  0x28   :  { %v218_v5 = vpack.c.bf16 %v56_v3, %v55_v2  ;;  %v221_v7 = vpack.c.bf16 %v58_v6, %v57_v4  ;;  %v59_v8 = vld [vmem:[#allocation6 + $0x20] sm:$0xff]  ;;  %v60_v9 = vld [vmem:[#allocation6 + $0x28] sm:$0xff]  ;;  %v61_v11 = vld [vmem:[#allocation6 + $0x30] sm:$0xff]  ;;  %s154_s12 = sshll.u32 %s328_s11, 4  ;;  %s155_s12 = int_to_ptr.vmem [resolvable:$true] %s154_s12 }
  0x29   :  { %v224_v10 = vpack.c.bf16 %v60_v9, %v59_v8  ;;  %v62_v12 = vld [vmem:[#allocation6 + $0x38] sm:$0xff]  ;;  %v63_v14 = vld [vmem:[#allocation6 + $0x40] sm:$0xff]  ;;  %v64_v15 = vld [vmem:[#allocation6 + $0x48] sm:$0xff]  ;;  %s293_s13 = scalar_lea.vmem %s155_s12, 128  ;;  %p298_p3 = scmp.lt.s32.totalorder %s155_s12, %s155_s12 }
  0x2a   :  { %219 = vmatpush3.bf16.msra.mxu0 %v218_v5  ;;  %v227_v13 = vpack.c.bf16 %v62_v12, %v61_v11  ;;  %v230_v16 = vpack.c.bf16 %v64_v15, %v63_v14  ;;  %v65_v17 = vld [vmem:[#allocation6 + $0x50] sm:$0xff]  ;;  %v66_v18 = vld [vmem:[#allocation6 + $0x58] sm:$0xff]  ;;  %v67_v20 = vld [vmem:[#allocation6 + $0x60] sm:$0xff]  ;;  %p294_p2 = scmp.ne.s32.totalorder %s155_s12, %s293_s13  ;;  %p299_p4 = scmp.lt.s32.totalorder %s293_s13, %s293_s13 }
  0x2b   :  { %220 = vmatprep.subr.bf16.mxu0 %v325_v0  ;;  %v233_v19 = vpack.c.bf16 %v66_v18, %v65_v17  ;;  %v68_v21 = vld [vmem:[#allocation6 + $0x68] sm:$0xff]  ;;  %v69_v23 = vld [vmem:[#allocation6 + $0x70] sm:$0xff]  ;;  %v70_v24 = vld [vmem:[#allocation6 + $0x78] sm:$0xff] }
  0x2c   :  { %v236_v22 = vpack.c.bf16 %v68_v21, %v67_v20  ;;  %v239_v25 = vpack.c.bf16 %v70_v24, %v69_v23  ;;  %v54_v26 = vld [vmem:[#allocation3] sm:$0xff]  ;;  %p300_p5 = por %p299_p4, %p298_p3 }
  0x2d   :  { %v164_v27 = vld [vmem:[%s397_s2] ss:$0 sm:$0xff] }
  0x2e   :  { %222 = vmatpush3.bf16.msra.mxu0 %v221_v7  ;;  %p301_p6 = pnand %p300_p5, %p294_p2 }
  0x2f   :  { %223 = vmatprep.subr.bf16.mxu0 %v325_v0 }
  0x32   :  { %225 = vmatpush3.bf16.msra.mxu0 %v224_v10 }
  0x33   :  { %226 = vmatprep.subr.bf16.mxu0 %v325_v0 }
  0x36   :  { %228 = vmatpush3.bf16.msra.mxu0 %v227_v13 }
  0x37   :  { %229 = vmatprep.subr.bf16.mxu0 %v325_v0 }
  0x3a   :  { %231 = vmatpush3.bf16.msra.mxu0 %v230_v16 }
  0x3b   :  { %232 = vmatprep.subr.bf16.mxu0 %v325_v0 }
  0x3e   :  { %234 = vmatpush3.bf16.msra.mxu0 %v233_v19 }
  0x3f   :  { %235 = vmatprep.subr.bf16.mxu0 %v325_v0 }
  0x42   :  { %237 = vmatpush3.bf16.msra.mxu0 %v236_v22 }
  0x43   :  { %238 = vmatprep.subr.bf16.mxu0 %v325_v0 }
  0x46   :  { %240 = vmatpush3.bf16.msra.mxu0 %v239_v25 }
  0x49   :  { %215 = vmatmul.mubr.f32.vlgmr.msra.gmra.mrb[0].mxu0 %v54_v26 }
 0x11c   :  { %v137_v28 = vpop.f32.mrb[0].mxu0 }
 0x11d   :  { %v141_v29 = vadd.f32 %v164_v27, %v137_v28  ;;  %v216_v30 = vpop.f32.mrb[1].mxu0 }
 0x11f   :  { %147 = vst [vmem:[#allocation8] sm:$0xff] %v141_v29 }
 0x120   :  { %304 = shalt.err (!%p301_p6)
}
 0x121   :  { %s305_s16 = scalar_lea.hbm %s398_s3, 128 }
 0x122   :  { %p306_p7 = scmp.ne.s32.totalorder %s398_s3, %s305_s16  ;;  %p309_p8 = scmp.lt.u32.totalorder %s305_s16, %s398_s3 }
 0x124   :  { %p311_p9 = pnand %p309_p8, %p306_p7 }
 0x126   :  { %314 = shalt.err (!%p311_p9)
}
 0x127   :  { %157 = dma.vmem_to_hbm [thread:$0]  %s155_s12, 128, %s398_s3, [#allocation5]  }
 0x128   :  { %319 = dma.done.wait [#allocation5], 128  }
 0x129   :  { %320 = vsyncadd [#allocation5], 4294967168 }
 0x12a   :  { %161 = vsyncpa [#allocation4], 1 }
 0x12b   :  { %162 = vsyncpa [#allocation7], 1 }
 0x12c   :  { %163 = vsyncpa [#allocation5], 1 }

</bundles_post_ra>
